<compile_context>
chip_gen: v5e
topology: v5e:2x2
jax: 0.10.0
libtpu: 0.0.40
codegen_flags: <defaults>
</compile_context>

<pallas_src>
import math

import jax
import jax.numpy as jnp
from jax.experimental import pallas as pl
from jax.experimental.pallas import tpu as pltpu


def _make_pe_buffer(d_model: int, max_len: int = 5000,
                    dtype=jnp.float32) -> jnp.ndarray:
    """[max_len, 1, d_model] buffer; same math as the nn.Module __init__.

    Built once (init time) in the activation dtype so forward never re-casts
    the whole max_len buffer (that cast was a hidden HBM pass every call).
    """
    position = jnp.arange(max_len, dtype=jnp.float32)[:, None]           # [L,1]
    div_term = jnp.exp(
        jnp.arange(0, d_model, 2, dtype=jnp.float32)
        * (-math.log(10000.0) / d_model))                                # [D/2]
    angles = position * div_term                                         # [L,D/2]
    pe = jnp.zeros((max_len, d_model), dtype=jnp.float32)
    pe = pe.at[:, 0::2].set(jnp.sin(angles))
    pe = pe.at[:, 1::2].set(jnp.cos(angles))
    return pe.astype(dtype)[:, None, :]                                  # [L,1,D]


def _pe_add_kernel(x_ref, pe_ref, o_ref):
    # x: (ts, tb, D) tile; pe: (ts, 1, D) tile -> broadcast over batch is a
    # cheap stride-0 sublane broadcast (same lane/sublane layout as x).
    o_ref[...] = (x_ref[...] + pe_ref[...]).astype(o_ref.dtype)


def _round_up(v: int, m: int) -> int:
    return ((v + m - 1) // m) * m


def _vmem_capacity_bytes() -> int:
    """Physical VMEM of the current generation (fallback: v7x-sized 64 MiB)."""
    try:
        info = pltpu.get_tpu_info()
        cap = getattr(info, "vmem_capacity_bytes", None)
        if cap:
            return int(cap)
    except Exception:
        pass
    return 64 << 20


def _choose_tiles(seq_len: int, batch: int, d_model: int,
                  x_itemsize: int, pe_itemsize: int):
    """Pick (seq_tile, batch_tile, vmem_limit_bytes).

    Last-two-block-dims rule: batch tile is the full batch or a multiple of 8;
    d_model is always full.  The leading (seq) dim has no sublane constraint,
    so ts is chosen purely from the VMEM budget, preferring divisors of
    seq_len and guaranteeing >= 2 grid steps (v7x megacore).
    """
    cap = _vmem_capacity_bytes()
    budget = int(cap * 0.4)               # VMEM this kernel may spend on blocks
    max_x_block = 8 << 20                 # diminishing returns past ~8 MiB/blk

    lane_d = _round_up(d_model, 128)      # lane padding of the last dim
    pe_row = 8 * lane_d * pe_itemsize     # (ts,1,D) block pads to 8 sublanes

    # Batch tile: keep the whole batch per block when a single seq row fits.
    one_row = _round_up(batch, 8) * lane_d * x_itemsize
    if 2 * (2 * one_row + pe_row) <= budget:
        tb = batch
    else:  # huge batch*d_model: split batch in multiples of 8
        tb = max(8, min(batch, (budget // (6 * lane_d * x_itemsize)) // 8 * 8))

    # Seq tile from the double-buffered {x-in, out, pe} VMEM cost per seq row.
    x_row = _round_up(tb, 8) * lane_d * x_itemsize
    per_row = 2 * (2 * x_row + pe_row)
    ts = max(1, budget // per_row)
    ts = min(ts, seq_len, max(1, max_x_block // (tb * d_model * x_itemsize)))

    # >= 2 grid steps so both v7x TensorCores get work (harmless on v5e/v6e).
    if ts >= seq_len and pl.cdiv(batch, tb) < 2 and seq_len >= 2:
        ts = (seq_len + 1) // 2

    # Prefer a ts that divides seq_len evenly (no padded/masked tail tile).
    for cand in range(ts, max(1, (3 * ts) // 4) - 1, -1):
        if seq_len % cand == 0:
            ts = cand
            break

    vmem_needed = ts * per_row + (2 << 20)          # + margin for scratch
    vmem_limit = max(32 << 20, min(int(cap * 0.85), vmem_needed + (4 << 20)))
    return ts, tb, vmem_limit


def positional_encoding_forward(x: jnp.ndarray, pe: jnp.ndarray) -> jnp.ndarray:
    """x: [seq_len, batch, d_model]; pe: [max_len, 1, d_model] or [max_len, d_model]."""
    seq_len, batch, d_model = x.shape

    if pe.ndim == 2:
        pe = pe[:, None, :]
    if pe.ndim != 3 or pe.shape[1] != 1 or pe.shape[2] != d_model:
        raise ValueError(f"bad pe shape {pe.shape} for d_model={d_model}")
    if seq_len > pe.shape[0]:
        raise ValueError(f"seq_len={seq_len} exceeds pe max_len={pe.shape[0]}")

    # TODO(synk): PyTorch keeps pe in f32 and type-promotes (bf16 x -> f32
    # out); we keep the activation dtype instead.  If the buffer dtype
    # differs, cast only the seq_len rows we actually need — never the whole
    # max_len buffer.
    if pe.dtype != x.dtype:
        pe = pe[:seq_len].astype(x.dtype)

    ts, tb, vmem_limit = _choose_tiles(
        seq_len, batch, d_model,
        jnp.dtype(x.dtype).itemsize, jnp.dtype(pe.dtype).itemsize)

    # batch innermost -> pe block index is independent of the innermost grid
    # axis, so its re-DMA is skipped across consecutive batch iterations.
    grid = (pl.cdiv(seq_len, ts), pl.cdiv(batch, tb))

    # TODO(synk): for batch<8 or d_model not a multiple of 128 the tiles stay
    # sublane/lane padded (masked stores); folding batch into the lane or
    # sublane dim needs an in-kernel repeat of the pe rows (cross-tile
    # reshape) and is left out to keep the lowering simple.
    # TODO(synk): callers that donate x could add input_output_aliases={0: 0}
    # to avoid a second [S,B,D] HBM allocation; not done here (x is reused).
    return pl.pallas_call(
        _pe_add_kernel,
        out_shape=jax.ShapeDtypeStruct((seq_len, batch, d_model), x.dtype),
        grid=grid,
        in_specs=[
            pl.BlockSpec((ts, tb, d_model), lambda i, j: (i, j, 0)),
            pl.BlockSpec((ts, 1, d_model), lambda i, j: (i, 0, 0)),
        ],
        out_specs=pl.BlockSpec((ts, tb, d_model), lambda i, j: (i, j, 0)),
        compiler_params=pltpu.CompilerParams(
            dimension_semantics=("parallel", "parallel"),
            vmem_limit_bytes=vmem_limit,
        ),
    )(x, pe)


if __name__ == "__main__":
    d_model = 32
    seq_len = 8
    batch = 2
    max_len = 64  # small synthetic buffer

    key = jax.random.PRNGKey(0)
    x = jax.random.normal(key, (seq_len, batch, d_model), dtype=jnp.float32)
    pe = _make_pe_buffer(d_model, max_len, dtype=x.dtype)   # [max_len, 1, D]

    out = jax.block_until_ready(positional_encoding_forward(x, pe))

    # Reference: exactly the nn.Module forward.
    ref = x + pe[:seq_len]
    assert out.shape == (seq_len, batch, d_model)
    assert jnp.allclose(out, ref, atol=1e-6), "mismatch vs reference"

    print("KERNEL_OK")
</pallas_src>

<mosaic_0001>
module attributes {stable_mosaic.version = 11 : i64} {
  func.func @_pe_add_kernel(%arg0: i32, %arg1: i32, %arg2: memref<4x2x32xf32, #tpu.memory_space<vmem>>, %arg3: memref<4x1x32xf32, #tpu.memory_space<vmem>>, %arg4: memref<4x2x32xf32, #tpu.memory_space<vmem>>) attributes {dimension_semantics = [#tpu.dimension_semantics<parallel>, #tpu.dimension_semantics<parallel>], iteration_bounds = array<i64: 2, 1>, scalar_prefetch = 0 : i64, scratch_operands = 0 : i64, tpu.core_type = #tpu.core_type<tc>, window_params = [{transform_indices = @transform_0, window_bounds = array<i64: 4, 2, 32>}, {transform_indices = @transform_1, window_bounds = array<i64: 4, 1, 32>}, {transform_indices = @transform_2, window_bounds = array<i64: 4, 2, 32>}]} {
    %c0 = arith.constant 0 : index
    %c0_0 = arith.constant 0 : index
    %c0_1 = arith.constant 0 : index
    %0 = vector.load %arg2[%c0, %c0_0, %c0_1] : memref<4x2x32xf32, #tpu.memory_space<vmem>>, vector<4x2x32xf32>
    %c0_2 = arith.constant 0 : index
    %c0_3 = arith.constant 0 : index
    %c0_4 = arith.constant 0 : index
    %1 = vector.load %arg3[%c0_2, %c0_3, %c0_4] : memref<4x1x32xf32, #tpu.memory_space<vmem>>, vector<4x1x32xf32>
    %2 = vector.broadcast %1 : vector<4x1x32xf32> to vector<4x2x32xf32>
    %3 = arith.addf %0, %2 : vector<4x2x32xf32>
    %c0_5 = arith.constant 0 : index
    %c0_6 = arith.constant 0 : index
    %c0_7 = arith.constant 0 : index
    %4 = vector.load %arg4[%c0_5, %c0_6, %c0_7] : memref<4x2x32xf32, #tpu.memory_space<vmem>>, vector<4x2x32xf32>
    tpu.vector_store %arg4[%c0_5, %c0_6, %c0_7], %3 {strides = array<i32>} : memref<4x2x32xf32, #tpu.memory_space<vmem>>, vector<4x2x32xf32>,
    return
  }
  func.func @transform_0(%arg0: i32, %arg1: i32) -> (i32, i32, i32) {
    %c0_i32 = arith.constant 0 : i32
    %c0_i32_0 = arith.constant 0 : i32
    return %arg0, %arg1, %c0_i32 : i32, i32, i32
  }
  func.func @transform_1(%arg0: i32, %arg1: i32) -> (i32, i32, i32) {
    %c0_i32 = arith.constant 0 : i32
    %c0_i32_0 = arith.constant 0 : i32
    %c0_i32_1 = arith.constant 0 : i32
    return %arg0, %c0_i32, %c0_i32_0 : i32, i32, i32
  }
  func.func @transform_2(%arg0: i32, %arg1: i32) -> (i32, i32, i32) {
    %c0_i32 = arith.constant 0 : i32
    %c0_i32_0 = arith.constant 0 : i32
    return %arg0, %arg1, %c0_i32 : i32, i32, i32
  }
}

</mosaic_0001>

<bundles_post_ra>
// kernel: tpu_custom_call.1
= control target key start
LH: loop header
LB: loop body
LE: loop exit
PB: predicated region body
PF: predicated region fallthrough
CT: control target
= control target key end

     0   :  { %7 = vsyncpa [#allocation3], 0  ;;  %s599_s0 = inlined_call_operand.vmem [shape: f32[8,2,32], index: 0, kind: input, shape index: {}]   ;;  %s600_s1 = inlined_call_operand.vmem [shape: f32[64,1,32], index: 1, kind: input, shape index: {}]   ;;  %s601_s2 = inlined_call_operand.hbm [shape: f32[8,2,32], index: 2, kind: output, shape index: {}]  }
   0x1   :  { %9 = vsyncpa [#allocation3 + $0x1], 0  ;;  %s492_s9 = smov 0   ;;  %s494_s10 = smov 0  }
   0x2   :  { %s496_s11 = smov 0   ;;  %s498_s12 = smov 0  }
   0x3   :  { %s500_s13 = smov 0   ;;  %s502_s14 = smov 0  }
   0x4 LB: > { %s319_s15 = sadd.s32 4294967295, %s473_s14   ;;  %s320_s16 = sadd.s32 4294967294, %s473_s14   ;;  %s473_s14 = sphi %s502_s14, %s15_s14   ;;  %s469_s13 = sphi %s500_s13, %s608_s13   ;;  %s465_s12 = sphi %s498_s12, %s607_s12   ;;  %s461_s11 = sphi %s496_s11, %s606_s11   ;;  %s457_s10 = sphi %s494_s10, %s605_s10   ;;  %s453_s9 = sphi %s492_s9, %s604_s9  }
   0x5   : > { %s27_s17 = sadd.s32 1, %s469_s13  ;;  %s90_s18 = sadd.s32 1, %s461_s11 }
   0x6   : > { %p29_p0 = scmp.ge.s32.totalorder %s27_s17, 2  ;;  %p100_p1 = scmp.ne.s32.totalorder %s461_s11, %s457_s10 }
   0x7   : > { %p101_p2 = scmp.eq.s32.totalorder %s319_s15, 1  ;;  %p106_p3 = scmp.ne.s32.totalorder %s457_s10, %s453_s9 }
   0x8   : > { %s610_s17 = smov (%p29_p0, %s27_s17), 0  ;;  %p107_p5 = scmp.eq.s32.totalorder %s320_s16, 1 }
   0x9   : > { %p532_p4 = por %p101_p2, %p100_p1  ;;  %s85_s20 = ssub.s32 %s469_s13, %s610_s17 }
   0xa   : > { %p323_p6 = scmp.ge.s32.totalorder %s473_s14, 1  ;;  %p88_p7 = scmp.eq.s32.totalorder %s85_s20, 0 }
   0xb   : > { %p539_p8 = por %p107_p5, %p106_p3  ;;  %p145_p9 = scmp.lt.s32.totalorder %s473_s14, 3 }
   0xc   : > { %s545_s22 = scalar_select %p88_p7, %s461_s11, %s90_s18  }
   0xd   : > { %p146_p10 = pnand %p323_p6, %p145_p9 }
   0xe   : > { %s171_s23 = sand.u32 (!%p146_p10), 1, %s457_s10   ;;  %s325_s24 = sshll.u32 (!%p146_p10), %s465_s12, 2 }
   0xf   : > { %149 = sbr.rel (%p146_p10) target bundleno = 38 (0x26), region = 28  ;;  %p175_p11 = scmp.lt.s32.totalorder (!%p146_p10), %s325_s24, 7 }
  0x10   : > { %s324_s25 = sshll.u32 (!%p146_p10), %s171_s23, 3  ;;  %p184_p12 = scmp.lt.s32.totalorder (!%p146_p10), %s325_s24, 63 }
  0x11   : > { %s173_s6 = scalar_lea.vmem (!%p146_p10), [#allocation2], %s324_s25  ;;  %s333_s8 = sshll.u32 (!%p146_p10), %s465_s12, 3 }
  0x12   : > { %s232_s7 = sshll.u32 (!%p146_p10), %s173_s6, 4  ;;  %s231_s18 = scalar_lea.hbm (!%p146_p10), %s601_s2, %s333_s8  ;;  %s233_s7 = int_to_ptr.vmem [resolvable:$true] %s232_s7 }
  0x13   : > { %s234_s20 = sshll.u32 (!%p146_p10), %s231_s18, 4  ;;  %s219_s12 = scalar_lea.sflag (!%p146_p10), [#allocation3], %s171_s23  ;;  %s235_s20 = int_to_ptr.hbm [resolvable:$true] %s234_s20 }
  0x14   : > { %s176_s26 = scalar_select %p175_p11, %s325_s24, 7  ;;  %vm213_vm0 = vcmask 254976  }
  0x15   : > { %s612_s24 = smov (!%p184_p12, %s325_s24), 63  ;;  %s415_s28 = scalar_lea.hbm %s601_s2, 16 }
  0x16   : > { %s326_s27 = sshll.u32 %s176_s26, 1  ;;  %s186_s5 = scalar_lea.vmem %s600_s1, %s612_s24 }
  0x17   : > { %s181_s30 = scalar_lea.vmem %s599_s0, %s326_s27  ;;  %v391_v1 = vld [vmem:[%s186_s5] ss:$0 sm:$0xff]  ;;  %v392_v4 = vld [vmem:[%s186_s5 + $0x1] ss:$0 sm:$0xff]  ;;  %v393_v6 = vld [vmem:[%s186_s5 + $0x2] ss:$0 sm:$0xff] }
  0x18   : > { %v189_v0 = vld [vmem:[%s181_s30] sm:$0x3]  ;;  %v190_v2 = vld [vmem:[%s181_s30 + $0x2] sm:$0x3]  ;;  %v191_v5 = vld [vmem:[%s181_s30 + $0x4] sm:$0x3] }
  0x19   : > { %v209_v3 = vadd.f32 %v391_v1, %v189_v0  ;;  %v192_v7 = vld [vmem:[%s181_s30 + $0x6] sm:$0x3]  ;;  %v210_v8 = vadd.f32 %v392_v4, %v190_v2  ;;  %v394_v9 = vld [vmem:[%s186_s5 + $0x3] ss:$0 sm:$0xff]  ;;  %v211_v10 = vadd.f32 %v393_v6, %v191_v5  ;;  %s409_s24 = sshra.s32 %s235_s20, 4  ;;  %s410_s24 = int_to_ptr.hbm [resolvable:$true] %s409_s24 }
  0x1a   : > { %v212_v11 = vadd.f32 %v394_v9, %v192_v7  ;;  %s411_s25 = scalar_lea.hbm %s410_s24, 8  ;;  %p416_p2 = scmp.lt.s32.totalorder %s410_s24, %s601_s2 }
  0x1b   : > { %214 = vst.msk [vmem:[%s173_s6] sm:$0x3] %vm213_vm0, %v209_v3  ;;  %p412_p13 = scmp.ne.s32.totalorder %s410_s24, %s411_s25  ;;  %p417_p3 = scmp.lt.s32.totalorder %s415_s28, %s411_s25 }
  0x1c   : > { %215 = vst.msk [vmem:[%s173_s6 + $0x2] sm:$0x3] %vm213_vm0, %v210_v8 }
  0x1d   : > { %216 = vst.msk [vmem:[%s173_s6 + $0x4] sm:$0x3] %vm213_vm0, %v211_v10  ;;  %p413_p0 = pnand %p412_p13, %p532_p4  ;;  %p418_p5 = por %p417_p3, %p416_p2 }
  0x1e   : > { %217 = vst.msk [vmem:[%s173_s6 + $0x6] sm:$0x3] %vm213_vm0, %v212_v11 }
  0x1f   : > { %p414_p1 = pneg %p413_p0 }
  0x21   : > { %p419_p6 = pnand %p418_p5, %p414_p1 }
  0x23   : > { %422 = shalt.err (!%p419_p6)
}
  0x24   : > { %s475_s23 = smov 32   ;;  %s476_s3 = smov 2  }
  0x25   : > { %334 = dma.vmem_to_hbm [thread:$0]  (%p532_p4), %s233_s7, 128, %s235_s20, %s219_s12, %s475_s23, %s475_s23, %s476_s3  }
  0x26 PF: > { %p340_p7 = scmp.ge.s32.totalorder %s473_s14, 2  ;;  %s249_s4 = sand.u32 1, %s453_s9  }
  0x27   : > { %s250_s5 = scalar_lea.sflag [#allocation3], %s249_s4 }
  0x28   : > { %p337_p9 = pnand %p340_p7, %p539_p8 }
  0x2a   : > { %p338_p10 = pneg %p337_p9 }
  0x2c   : > { %448 = dma.done.wait (%p338_p10), %s250_s5, 128  }
  0x2d   : > { %450 = vsyncadd (%p338_p10), %s250_s5, 4294967168  ;;  %s15_s14 = sadd.s32 1, %s473_s14   ;;  %s604_s9 = smov %s457_s10 }
  0x2e   : > { %p12_p11 = scmp.ge.s32.totalorder %s15_s14, 4   ;;  %s605_s10 = smov %s461_s11 }
  0x2f   : > { %s606_s11 = smov %s545_s22  ;;  %s607_s12 = smov %s469_s13 }
  0x30   : > { %s608_s13 = smov %s610_s17  ;;  %14 = sbr.rel (!%p12_p11) target bundleno = 4 (0x4), region = 66 }
  0x35   :  { %256 = vsyncpa [#allocation3], 1 }
  0x36   :  { %258 = vsyncpa [#allocation3 + $0x1], 1 }

</bundles_post_ra>
